<compile_context>
chip_gen: v5e
topology: v5e:2x2
jax: 0.10.0
libtpu: 0.0.40
codegen_flags: <defaults>
</compile_context>

<pallas_src>
import jax
import jax.numpy as jnp
from jax.experimental import pallas as pl
from jax.experimental.pallas import tpu as pltpu

LANE = 128
_MiB = 1024 * 1024
# Widest-first lane-width candidates (all multiples of 128) for the 2-D view.
_LANE_CANDIDATES = (256 * LANE, 64 * LANE, 16 * LANE, 8 * LANE,
                    4 * LANE, 2 * LANE, LANE)


def _tpu_vmem_capacity_bytes() -> int:
    """Physical VMEM capacity per TensorCore (conservative fallback: 64 MiB)."""
    try:
        cap = int(getattr(pltpu.get_tpu_info(), "vmem_capacity_bytes"))
        if cap > 0:
            return cap
    except Exception:
        pass
    return 64 * _MiB  # v7x per-TC size; safe lower bound everywhere


def _block_byte_budget() -> int:
    # 2 arrays (in + out) x double-buffering = 4 live blocks.  Keep the block
    # at min(cap/8, 8 MiB): 8 MiB blocks sit well past the measured ~85%
    # HBM-roofline knee while 4x8 MiB = 32 MiB stays inside the raised limit.
    cap = _tpu_vmem_capacity_bytes()
    return min(cap // 8, 8 * _MiB)


def _vmem_limit_bytes() -> int:
    # Enough for 4 x 8 MiB buffers + headroom, never more than 3/4 of physical
    # VMEM (do NOT size against 128 MiB on v7x, which only has 64 MiB per TC).
    cap = _tpu_vmem_capacity_bytes()
    return min(48 * _MiB, (cap * 3) // 4)


def _copy_kernel(x_ref, o_ref):
    # Identity copy of the current tile (the only data movement of a
    # materialized flatten).  Must stay an identity: boundary blocks rely on
    # Pallas OOB padding/masking.
    o_ref[...] = x_ref[...]


def _compiler_params():
    return pltpu.CompilerParams(
        # Pure copy: no-op on single-TC chips, shards the grid axis across the
        # two TensorCores on v7x.
        dimension_semantics=("parallel",),
        vmem_limit_bytes=_vmem_limit_bytes(),
    )


def _copy_2d(x2d: jax.Array) -> jax.Array:
    """Pallas tiled copy of a 2-D array whose last dim is a multiple of 128."""
    R, C = x2d.shape
    itemsize = jnp.dtype(x2d.dtype).itemsize
    # Sublane packing: 8 rows for 32-bit, 16 for 16-bit, 32 for 8-bit dtypes.
    sublane_pack = 8 * max(1, 4 // itemsize)

    # Rows per block: fill the per-block byte budget, rounded down to the
    # sublane packing.
    tr = (_block_byte_budget() // (C * itemsize)) // sublane_pack * sublane_pack
    tr = max(tr, sublane_pack)

    # Megacore: for arrays past a few MiB make sure the grid has >= 2 steps so
    # ("parallel",) actually splits the DMA work across both v7x TensorCores.
    total_bytes = R * C * itemsize
    if total_bytes > 4 * _MiB and R > sublane_pack:
        half_rows = -(-R // 2)                                    # cdiv(R, 2)
        half_rows = -(-half_rows // sublane_pack) * sublane_pack  # round up
        tr = min(tr, half_rows)

    if tr >= R:
        tr = R  # full-extent block bypasses the (8,128) rule for small arrays

    grid = (pl.cdiv(R, tr),)

    return pl.pallas_call(
        _copy_kernel,
        out_shape=jax.ShapeDtypeStruct((R, C), x2d.dtype),
        grid_spec=pltpu.PrefetchScalarGridSpec(
            num_scalar_prefetch=0,
            grid=grid,
            in_specs=[pl.BlockSpec((tr, C), lambda i: (i, 0))],
            out_specs=pl.BlockSpec((tr, C), lambda i: (i, 0)),
        ),
        compiler_params=_compiler_params(),
        cost_estimate=pl.CostEstimate(
            flops=0, transcendentals=0, bytes_accessed=2 * R * C * itemsize),
        # Identity copy, identical shape/dtype: let XLA reuse / elide the
        # buffer (halves peak HBM footprint; zero correctness risk).
        input_output_aliases={0: 0},
    )(x2d)


def _copy_1d(flat: jax.Array) -> jax.Array:
    """Single-pass tiled copy for element counts not divisible by 128.

    Pallas masks the partial last block, so no pad / slice passes are needed.
    Blocks are kept modest (<= 64K elements) since 1-D VMEM tiles are less
    lane/sublane-dense than the 2-D path; this path only handles rare ragged
    sizes.
    """
    (n,) = flat.shape
    itemsize = jnp.dtype(flat.dtype).itemsize
    block = _block_byte_budget() // itemsize
    block = max(LANE, min((block // LANE) * LANE, 512 * LANE))
    if block >= n:
        block = n  # full-extent block (always legal)

    grid = (pl.cdiv(n, block),)

    return pl.pallas_call(
        _copy_kernel,
        out_shape=jax.ShapeDtypeStruct((n,), flat.dtype),
        grid_spec=pltpu.PrefetchScalarGridSpec(
            num_scalar_prefetch=0,
            grid=grid,
            in_specs=[pl.BlockSpec((block,), lambda i: (i,))],
            out_specs=pl.BlockSpec((block,), lambda i: (i,)),
        ),
        compiler_params=_compiler_params(),
        cost_estimate=pl.CostEstimate(
            flops=0, transcendentals=0, bytes_accessed=2 * n * itemsize),
        input_output_aliases={0: 0},
    )(flat)


def flattern_forward(x: jax.Array) -> jax.Array:
    """Forward of the PyTorch `Flattern` module: x -> x.flatten().

    Row-major flatten of a contiguous array is metadata-only, so the fastest
    correct implementation on every TPU generation is the free reshape: zero
    HBM traffic, zero kernel-launch overhead.  Use `flattern_materialize` when
    a physically fresh flat buffer is required.
    """
    return jnp.reshape(x, (-1,))


def flattern_materialize(x: jax.Array) -> jax.Array:
    """Flatten AND force a freshly materialized buffer via a Pallas copy.

    Semantically identical to `flattern_forward`; single HBM read + write.
    """
    flat = jnp.reshape(x, (-1,))  # metadata-only row-major flatten
    total = flat.size
    if total == 0:
        return flat

    if total % LANE == 0:
        # Lane-dense 2-D view (last dim the widest multiple of 128 dividing
        # the element count) copied in multi-MiB blocks: unmasked wide vst,
        # few large DMA descriptors, one HBM pass.
        C = next(c for c in _LANE_CANDIDATES if total % c == 0)
        R = total // C
        out2d = _copy_2d(jnp.reshape(flat, (R, C)))
        return jnp.reshape(out2d, (-1,))

    # Ragged element count: single-pass 1-D tiled copy (Pallas masks the
    # partial last block) instead of the old pad/copy/slice 3-pass fallback.
    return _copy_1d(flat)


if __name__ == "__main__":
    key = jax.random.PRNGKey(0)

    # NCHW input, small shape: batch=2, channels=4, spatial=16x16 (2048 elems).
    x = jax.random.normal(key, (2, 4, 16, 16), dtype=jnp.float32)
    ref = jnp.reshape(x, (-1,))

    # 1) Module forward: metadata-only fast path (no kernel, no HBM traffic).
    y = flattern_forward(x)
    jax.block_until_ready(y)
    assert y.shape == ref.shape and y.dtype == ref.dtype
    assert bool(jnp.all(y == ref))

    # 2) Pallas materializing copy (128-aligned -> lane-dense 2-D kernel).
    ym = flattern_materialize(x)
    jax.block_until_ready(ym)
    assert ym.shape == ref.shape and ym.dtype == ref.dtype
    assert bool(jnp.all(ym == ref))

    # 3) Pallas materializing copy, ragged element count (105 elems ->
    #    single-pass 1-D kernel, no pad/slice).
    x2 = jax.random.normal(jax.random.PRNGKey(1), (3, 5, 7), dtype=jnp.float32)
    ref2 = jnp.reshape(x2, (-1,))
    y2 = flattern_materialize(x2)
    jax.block_until_ready(y2)
    assert y2.shape == ref2.shape and y2.dtype == ref2.dtype
    assert bool(jnp.all(y2 == ref2))

    print("KERNEL_OK")
</pallas_src>

<mosaic_0001>
module attributes {stable_mosaic.version = 11 : i64} {
  func.func @_copy_kernel(%arg0: i32, %arg1: memref<1x2048xf32, #tpu.memory_space<vmem>>, %arg2: memref<1x2048xf32, #tpu.memory_space<vmem>>) attributes {dimension_semantics = [#tpu.dimension_semantics<parallel>], iteration_bounds = array<i64: 1>, scalar_prefetch = 0 : i64, scratch_operands = 0 : i64, tpu.core_type = #tpu.core_type<tc>, window_params = [{transform_indices = @transform_0, window_bounds = array<i64: 1, 2048>}, {transform_indices = @transform_1, window_bounds = array<i64: 1, 2048>}]} {
    %c0 = arith.constant 0 : index
    %c0_0 = arith.constant 0 : index
    %0 = vector.load %arg1[%c0, %c0_0] : memref<1x2048xf32, #tpu.memory_space<vmem>>, vector<1x2048xf32>
    %c0_1 = arith.constant 0 : index
    %c0_2 = arith.constant 0 : index
    %1 = vector.load %arg2[%c0_1, %c0_2] : memref<1x2048xf32, #tpu.memory_space<vmem>>, vector<1x2048xf32>
    tpu.vector_store %arg2[%c0_1, %c0_2], %0 {strides = array<i32>} : memref<1x2048xf32, #tpu.memory_space<vmem>>, vector<1x2048xf32>,
    return
  }
  func.func @transform_0(%arg0: i32) -> (i32, i32) {
    %c0_i32 = arith.constant 0 : i32
    %c0_i32_0 = arith.constant 0 : i32
    return %arg0, %c0_i32 : i32, i32
  }
  func.func @transform_1(%arg0: i32) -> (i32, i32) {
    %c0_i32 = arith.constant 0 : i32
    %c0_i32_0 = arith.constant 0 : i32
    return %arg0, %c0_i32 : i32, i32
  }
}

</mosaic_0001>

<bundles_post_ra>
// kernel: tpu_custom_call.1
= control target key start
LH: loop header
LB: loop body
LE: loop exit
PB: predicated region body
PF: predicated region fallthrough
CT: control target
= control target key end

     0   :  { %6 = vsyncpa [#allocation3], 0  ;;  %s116_s0 = inlined_call_operand.hbm [shape: f32[1,2048], index: 0, kind: input, shape index: {}, may-alias: {0,1}]   ;;  %s117_s1 = inlined_call_operand.hbm [shape: f32[1,2048], index: 1, kind: output, shape index: {}, may-alias: {0,1}]  }
   0x1   :  { %7 = vsyncpa [#allocation4], 0  ;;  %s13_s8 = sshll.u32 %s116_s0, 4  ;;  %s98_s9 = smov [#allocation2]   ;;  %s14_s8 = int_to_ptr.hbm [resolvable:$true] %s13_s8 }
   0x2   :  { %s15_s10 = sshll.u32 %s98_s9, 4  ;;  %s16_s10 = int_to_ptr.vmem [resolvable:$true] %s15_s10 }
   0x3   :  { %18 = dma.hbm_to_vmem [thread:$0]  %s14_s8, 256, %s16_s10, [#allocation3]  }
   0x4   :  { %94 = dma.done.wait [#allocation3], 256  }
   0x5   :  { %95 = vsyncadd [#allocation3], 4294967040  ;;  %s99_s11 = smov [#allocation5]   ;;  %s34_s15 = sshll.u32 %s117_s1, 4  ;;  %v23_v0 = vld [vmem:[#allocation2] sm:$0xff]  ;;  %v24_v1 = vld [vmem:[#allocation2 + $0x8] sm:$0xff]  ;;  %s35_s15 = int_to_ptr.hbm [resolvable:$true] %s34_s15 }
   0x6   :  { %s32_s12 = sshll.u32 %s99_s11, 4  ;;  %25 = vst [vmem:[#allocation5] sm:$0xff] %v23_v0  ;;  %s33_s12 = int_to_ptr.vmem [resolvable:$true] %s32_s12 }
   0x7   :  { %26 = vst [vmem:[#allocation5 + $0x8] sm:$0xff] %v24_v1 }
   0x8   :  { %37 = dma.vmem_to_hbm [thread:$0]  %s33_s12, 256, %s35_s15, [#allocation4]  }
   0x9   :  { %96 = dma.done.wait [#allocation4], 256  }
   0xa   :  { %97 = vsyncadd [#allocation4], 4294967040 }
   0xb   :  { %42 = vsyncpa [#allocation3], 1 }
   0xc   :  { %43 = vsyncpa [#allocation4], 1 }

</bundles_post_ra>
